<compile_context>
chip_gen: v7x
topology: tpu7x:2x2x1
jax: 0.10.0
libtpu: 0.0.40
codegen_flags: <defaults>
</compile_context>

<pallas_src>
import functools

import jax
import jax.numpy as jnp
from jax.experimental import pallas as pl
from jax.experimental.pallas import tpu as pltpu

_EPS = 1e-5
_LANES = 128
_VMEM_LIMIT = 32 * 1024 * 1024        # explicit scoped-VMEM budget (all chips)


def _round_up(x, m):
    return (x + m - 1) // m * m


# ----------------------------- phase 1 kernel -------------------------------
def _conv_stats_kernel(p_ref, w_ref, conv_ref, sum_ref, ssq_ref):
    """Fused 3x3 conv (one matmul, K=9C) + per-channel sum / sum-of-squares.

    p_ref:    (TM, 9*C)   im2col patch tile
    w_ref:    (9*C, Cp)   conv weight, output channels padded to 128 lanes
    conv_ref: (TM, Cp)    conv output tile
    sum_ref:  (1, Cp)     running per-channel sum      (accumulated over grid)
    ssq_ref:  (1, Cp)     running per-channel sum(x^2) (accumulated over grid)
    """
    i = pl.program_id(0)

    acc = jnp.dot(p_ref[...], w_ref[...], preferred_element_type=jnp.float32)
    conv_ref[...] = acc

    tile_sum = jnp.sum(acc, axis=0, keepdims=True)
    tile_ssq = jnp.sum(acc * acc, axis=0, keepdims=True)

    @pl.when(i == 0)
    def _():
        sum_ref[...] = tile_sum
        ssq_ref[...] = tile_ssq

    @pl.when(i > 0)
    def _():
        sum_ref[...] = sum_ref[...] + tile_sum
        ssq_ref[...] = ssq_ref[...] + tile_ssq


# ----------------------------- phase 2 kernel -------------------------------
def _bn_relu_res_kernel(conv_ref, x_ref, sum_ref, ssq_ref, g_ref, b_ref,
                        out_ref, *, inv_m):
    """BatchNorm (batch stats, biased var) + ReLU + residual add."""
    mean = sum_ref[...] * inv_m                       # (1, Cp)
    var = ssq_ref[...] * inv_m - mean * mean          # E[x^2] - E[x]^2, f32
    inv_std = jax.lax.rsqrt(var + _EPS)
    scale = g_ref[...] * inv_std
    shift = b_ref[...] - mean * scale
    y = conv_ref[...] * scale + shift
    out_ref[...] = jnp.maximum(y, 0.0) + x_ref[...]


# -------------------------------- wrapper -----------------------------------
def resblock_forward(x_nchw, w_oihw, gamma, beta, *, tm=512):
    """x_nchw: (N, C, H, W) f32, w_oihw: (C, C, 3, 3) f32, gamma/beta: (C,)."""
    N, C, H, W = x_nchw.shape
    M = N * H * W
    K = 9 * C
    Cp = _round_up(C, _LANES)                 # lane-dense store/channel axis
    tm = max(8, (int(tm) // 8) * 8)           # sublane-aligned M tile
    Mp = _round_up(M, tm)
    n_tiles = Mp // tm

    # --- layout glue (pure XLA): NCHW -> NHWC, pad, build ONE (M, 9C) array ---
    xf = x_nchw.astype(jnp.float32)
    x_nhwc = jnp.transpose(xf, (0, 2, 3, 1))
    xp = jnp.pad(x_nhwc, ((0, 0), (1, 1), (1, 1), (0, 0)))
    taps = [xp[:, kh:kh + H, kw:kw + W, :].reshape(M, C)
            for kh in range(3) for kw in range(3)]
    patches = jnp.concatenate(taps, axis=1)                    # (M, 9*C)
    patches = jnp.pad(patches, ((0, Mp - M), (0, 0)))          # zero pad rows

    # conv weight (Cout, Cin, 3, 3) -> (kh, kw, Cin, Cout) -> (9C, C) -> (9C, Cp)
    w2d = jnp.transpose(w_oihw.astype(jnp.float32), (2, 3, 1, 0)).reshape(K, C)
    w2d = jnp.pad(w2d, ((0, 0), (0, Cp - C)))

    x2d = jnp.pad(x_nhwc.reshape(M, C), ((0, Mp - M), (0, Cp - C)))
    gamma2d = jnp.pad(gamma.astype(jnp.float32).reshape(1, C),
                      ((0, 0), (0, Cp - C)))
    beta2d = jnp.pad(beta.astype(jnp.float32).reshape(1, C),
                     ((0, 0), (0, Cp - C)))

    # ---------------- phase 1: conv + global BN statistics ----------------
    conv_flops = 2 * Mp * K * Cp
    conv_bytes = 4 * (Mp * K + K * Cp + Mp * Cp + 2 * Cp)
    conv, csum, cssq = pl.pallas_call(
        _conv_stats_kernel,
        out_shape=(
            jax.ShapeDtypeStruct((Mp, Cp), jnp.float32),
            jax.ShapeDtypeStruct((1, Cp), jnp.float32),
            jax.ShapeDtypeStruct((1, Cp), jnp.float32),
        ),
        grid_spec=pltpu.PrefetchScalarGridSpec(
            num_scalar_prefetch=0,
            grid=(n_tiles,),
            in_specs=[
                pl.BlockSpec((tm, K), lambda i: (i, 0)),     # patch tile
                pl.BlockSpec((K, Cp), lambda i: (0, 0)),     # weight (resident)
            ],
            out_specs=[
                pl.BlockSpec((tm, Cp), lambda i: (i, 0)),    # conv tile
                pl.BlockSpec((1, Cp), lambda i: (0, 0)),     # sum accumulator
                pl.BlockSpec((1, Cp), lambda i: (0, 0)),     # sumsq accumulator
            ],
        ),
        compiler_params=pltpu.CompilerParams(
            dimension_semantics=("arbitrary",),              # global reduction
            vmem_limit_bytes=_VMEM_LIMIT),
        cost_estimate=pl.CostEstimate(
            flops=conv_flops, transcendentals=0, bytes_accessed=conv_bytes),
    )(patches, w2d)

    # ---------------- phase 2: BN apply + ReLU + residual ----------------
    bn_bytes = 4 * (3 * Mp * Cp + 4 * Cp)
    out2d = pl.pallas_call(
        functools.partial(_bn_relu_res_kernel, inv_m=1.0 / float(M)),
        out_shape=jax.ShapeDtypeStruct((Mp, Cp), jnp.float32),
        grid_spec=pltpu.PrefetchScalarGridSpec(
            num_scalar_prefetch=0,
            grid=(n_tiles,),
            in_specs=[
                pl.BlockSpec((tm, Cp), lambda i: (i, 0)),    # conv tile
                pl.BlockSpec((tm, Cp), lambda i: (i, 0)),    # residual tile
                pl.BlockSpec((1, Cp), lambda i: (0, 0)),     # sum
                pl.BlockSpec((1, Cp), lambda i: (0, 0)),     # sumsq
                pl.BlockSpec((1, Cp), lambda i: (0, 0)),     # gamma
                pl.BlockSpec((1, Cp), lambda i: (0, 0)),     # beta
            ],
            out_specs=pl.BlockSpec((tm, Cp), lambda i: (i, 0)),
        ),
        compiler_params=pltpu.CompilerParams(
            dimension_semantics=("parallel",),               # v7x: 2 TCs
            vmem_limit_bytes=_VMEM_LIMIT),
        cost_estimate=pl.CostEstimate(
            flops=5 * Mp * Cp, transcendentals=Cp, bytes_accessed=bn_bytes),
    )(conv, x2d, csum, cssq, gamma2d, beta2d)

    out = out2d[:M, :C].reshape(N, H, W, C)
    return jnp.transpose(out, (0, 3, 1, 2)).astype(x_nchw.dtype)


# ------------------------------ reference -----------------------------------
def resblock_reference(x_nchw, w_oihw, gamma, beta):
    """Pure-JAX reference mirroring the PyTorch forward (training-mode BN)."""
    out = jax.lax.conv_general_dilated(
        x_nchw, w_oihw, window_strides=(1, 1), padding=((1, 1), (1, 1)),
        dimension_numbers=("NCHW", "OIHW", "NCHW"))
    mean = out.mean(axis=(0, 2, 3), keepdims=True)
    var = out.var(axis=(0, 2, 3), keepdims=True)             # biased variance
    outn = (out - mean) / jnp.sqrt(var + _EPS)
    outn = outn * gamma.reshape(1, -1, 1, 1) + beta.reshape(1, -1, 1, 1)
    return jnp.maximum(outn, 0.0) + x_nchw


def _make_params(key, c):
    # Matches the module init: kaiming_normal_(relu) -> std = sqrt(2/fan_in),
    # BN weight = 0.5, BN bias = 0.
    fan_in = c * 9
    w = jax.random.normal(key, (c, c, 3, 3), jnp.float32) * jnp.sqrt(2.0 / fan_in)
    gamma = jnp.full((c,), 0.5, jnp.float32)
    beta = jnp.zeros((c,), jnp.float32)
    return w, gamma, beta


if __name__ == "__main__":
    key = jax.random.PRNGKey(0)

    # Small spec shape (2,4,16,16) plus the realistic ResNet resblock shape
    # (n_chans1=32 on the 14x14 post-pool MNIST feature map).  tm=128 makes
    # the grid >1 so the tiled accumulator path is actually exercised.
    for (n, c, h, w_sp), tm in (((2, 4, 16, 16), 128), ((2, 32, 14, 14), 128)):
        key, k_x, k_w = jax.random.split(key, 3)
        x = jax.random.normal(k_x, (n, c, h, w_sp), dtype=jnp.float32)
        w, gamma, beta = _make_params(k_w, c)

        out = jax.block_until_ready(resblock_forward(x, w, gamma, beta, tm=tm))
        ref = jax.block_until_ready(resblock_reference(x, w, gamma, beta))

        assert out.shape == x.shape, out.shape
        max_err = float(jnp.max(jnp.abs(out - ref)))
        assert jnp.allclose(out, ref, atol=2e-4, rtol=2e-4), max_err

    print("KERNEL_OK")
</pallas_src>

<mosaic_0001>
module attributes {stable_mosaic.version = 11 : i64} {
  func.func @_conv_stats_kernel(%arg0: i32, %arg1: memref<128x36xf32, #tpu.memory_space<vmem>>, %arg2: memref<36x128xf32, #tpu.memory_space<vmem>>, %arg3: memref<128x128xf32, #tpu.memory_space<vmem>>, %arg4: memref<1x128xf32, #tpu.memory_space<vmem>>, %arg5: memref<1x128xf32, #tpu.memory_space<vmem>>) attributes {dimension_semantics = [#tpu.dimension_semantics<arbitrary>], iteration_bounds = array<i64: 4>, scalar_prefetch = 0 : i64, scratch_operands = 0 : i64, tpu.core_type = #tpu.core_type<tc>, window_params = [{transform_indices = @transform_0, window_bounds = array<i64: 128, 36>}, {pipeline_mode = #tpu.pipeline_mode<synchronous>, transform_indices = @transform_1, window_bounds = array<i64: 36, 128>}, {transform_indices = @transform_2, window_bounds = array<i64: 128, 128>}, {pipeline_mode = #tpu.pipeline_mode<synchronous>, transform_indices = @transform_3, window_bounds = array<i64: 1, 128>}, {pipeline_mode = #tpu.pipeline_mode<synchronous>, transform_indices = @transform_4, window_bounds = array<i64: 1, 128>}]} {
    %c0 = arith.constant 0 : index
    %c0_0 = arith.constant 0 : index
    %0 = vector.load %arg1[%c0, %c0_0] : memref<128x36xf32, #tpu.memory_space<vmem>>, vector<128x36xf32>
    %c0_1 = arith.constant 0 : index
    %c0_2 = arith.constant 0 : index
    %1 = vector.load %arg2[%c0_1, %c0_2] : memref<36x128xf32, #tpu.memory_space<vmem>>, vector<36x128xf32>
    %cst = arith.constant dense<0.000000e+00> : vector<128x128xf32>
    %2 = tpu.matmul %0, %1, %cst {dimension_numbers = #tpu.dot_dimension_numbers<[1], [0], [0], [1], [0, 0, 1, 1], [], []>} : vector<128x36xf32>, vector<36x128xf32>, vector<128x128xf32> -> vector<128x128xf32>
    %c0_3 = arith.constant 0 : index
    %c0_4 = arith.constant 0 : index
    %3 = vector.load %arg3[%c0_3, %c0_4] : memref<128x128xf32, #tpu.memory_space<vmem>>, vector<128x128xf32>
    tpu.vector_store %arg3[%c0_3, %c0_4], %2 {strides = array<i32>} : memref<128x128xf32, #tpu.memory_space<vmem>>, vector<128x128xf32>,
    %cst_5 = arith.constant dense<0.000000e+00> : vector<128xf32>
    %4 = vector.multi_reduction <add>, %2, %cst_5 [0] : vector<128x128xf32> to vector<128xf32>
    %5 = vector.shape_cast %4 : vector<128xf32> to vector<1x128xf32>
    %6 = arith.mulf %2, %2 : vector<128x128xf32>
    %cst_6 = arith.constant dense<0.000000e+00> : vector<128xf32>
    %7 = vector.multi_reduction <add>, %6, %cst_6 [0] : vector<128x128xf32> to vector<128xf32>
    %8 = vector.shape_cast %7 : vector<128xf32> to vector<1x128xf32>
    %c0_i32 = arith.constant 0 : i32
    %9 = arith.cmpi eq, %arg0, %c0_i32 : i32
    %10 = arith.extui %9 : i1 to i32
    %c0_i32_7 = arith.constant 0 : i32
    %11 = arith.cmpi ne, %10, %c0_i32_7 : i32
    scf.if %11 {
      %c0_10 = arith.constant 0 : index
      %c0_11 = arith.constant 0 : index
      %15 = vector.load %arg4[%c0_10, %c0_11] : memref<1x128xf32, #tpu.memory_space<vmem>>, vector<1x128xf32>
      tpu.vector_store %arg4[%c0_10, %c0_11], %5 {strides = array<i32>} : memref<1x128xf32, #tpu.memory_space<vmem>>, vector<1x128xf32>,
      %c0_12 = arith.constant 0 : index
      %c0_13 = arith.constant 0 : index
      %16 = vector.load %arg5[%c0_12, %c0_13] : memref<1x128xf32, #tpu.memory_space<vmem>>, vector<1x128xf32>
      tpu.vector_store %arg5[%c0_12, %c0_13], %8 {strides = array<i32>} : memref<1x128xf32, #tpu.memory_space<vmem>>, vector<1x128xf32>,
    } else {
    }
    %c0_i32_8 = arith.constant 0 : i32
    %12 = arith.cmpi sgt, %arg0, %c0_i32_8 : i32
    %13 = arith.extui %12 : i1 to i32
    %c0_i32_9 = arith.constant 0 : i32
    %14 = arith.cmpi ne, %13, %c0_i32_9 : i32
    scf.if %14 {
      %c0_10 = arith.constant 0 : index
      %c0_11 = arith.constant 0 : index
      %15 = vector.load %arg4[%c0_10, %c0_11] : memref<1x128xf32, #tpu.memory_space<vmem>>, vector<1x128xf32>
      %16 = arith.addf %15, %5 : vector<1x128xf32>
      %c0_12 = arith.constant 0 : index
      %c0_13 = arith.constant 0 : index
      %17 = vector.load %arg4[%c0_12, %c0_13] : memref<1x128xf32, #tpu.memory_space<vmem>>, vector<1x128xf32>
      tpu.vector_store %arg4[%c0_12, %c0_13], %16 {strides = array<i32>} : memref<1x128xf32, #tpu.memory_space<vmem>>, vector<1x128xf32>,
      %c0_14 = arith.constant 0 : index
      %c0_15 = arith.constant 0 : index
      %18 = vector.load %arg5[%c0_14, %c0_15] : memref<1x128xf32, #tpu.memory_space<vmem>>, vector<1x128xf32>
      %19 = arith.addf %18, %8 : vector<1x128xf32>
      %c0_16 = arith.constant 0 : index
      %c0_17 = arith.constant 0 : index
      %20 = vector.load %arg5[%c0_16, %c0_17] : memref<1x128xf32, #tpu.memory_space<vmem>>, vector<1x128xf32>
      tpu.vector_store %arg5[%c0_16, %c0_17], %19 {strides = array<i32>} : memref<1x128xf32, #tpu.memory_space<vmem>>, vector<1x128xf32>,
    } else {
    }
    return
  }
  func.func @transform_0(%arg0: i32) -> (i32, i32) {
    %c0_i32 = arith.constant 0 : i32
    %c0_i32_0 = arith.constant 0 : i32
    return %arg0, %c0_i32 : i32, i32
  }
  func.func @transform_1(%arg0: i32) -> (i32, i32) {
    %c0_i32 = arith.constant 0 : i32
    %c0_i32_0 = arith.constant 0 : i32
    %c0_i32_1 = arith.constant 0 : i32
    return %c0_i32, %c0_i32_0 : i32, i32
  }
  func.func @transform_2(%arg0: i32) -> (i32, i32) {
    %c0_i32 = arith.constant 0 : i32
    %c0_i32_0 = arith.constant 0 : i32
    return %arg0, %c0_i32 : i32, i32
  }
  func.func @transform_3(%arg0: i32) -> (i32, i32) {
    %c0_i32 = arith.constant 0 : i32
    %c0_i32_0 = arith.constant 0 : i32
    %c0_i32_1 = arith.constant 0 : i32
    return %c0_i32, %c0_i32_0 : i32, i32
  }
  func.func @transform_4(%arg0: i32) -> (i32, i32) {
    %c0_i32 = arith.constant 0 : i32
    %c0_i32_0 = arith.constant 0 : i32
    %c0_i32_1 = arith.constant 0 : i32
    return %c0_i32, %c0_i32_0 : i32, i32
  }
}

</mosaic_0001>

<bundles_post_ra>
// kernel: tpu_custom_call.1
= control target key start
LH: loop header
LB: loop body
LE: loop exit
PB: predicated region body
PF: predicated region fallthrough
CT: control target
= control target key end

     0   :  { %10 = vsyncpa [#allocation3], 0  ;;  %s1155_s0 = inlined_call_operand.vmem [shape: f32[512,36], index: 0, kind: input, shape index: {}]   ;;  %s1156_s1 = inlined_call_operand.vmem [shape: f32[36,128], index: 1, kind: input, shape index: {}]   ;;  %s1157_s2 = inlined_call_operand.hbm [shape: f32[512,128], index: 2, kind: output, shape index: {0}]   ;;  %s1158_s3 = inlined_call_operand.hbm [shape: f32[1,128], index: 3, kind: output, shape index: {1}]   ;;  %s1159_s4 = inlined_call_operand.hbm [shape: f32[1,128], index: 4, kind: output, shape index: {2}]  }
   0x1   :  { %12 = vsyncpa [#allocation3 + $0x1], 0 }
   0x2   :  { %13 = vsyncpa [#allocation5], 0  ;;  %s933_s15 = smov 0   ;;  %s935_s16 = smov 0  }
   0x3   :  { %s937_s17 = smov 0   ;;  %s939_s18 = smov 0  }
   0x4 LB: > { %s954_s19 = sadd.s32 4294967295, %s901_s18   ;;  %s623_s20 = sadd.s32 4294967294, %s901_s18   ;;  %s901_s18 = sphi %s939_s18, %s1165_s18   ;;  %s897_s17 = sphi %s937_s17, %s1164_s17   ;;  %s893_s16 = sphi %s935_s16, %s1163_s16   ;;  %s889_s15 = sphi %s933_s15, %s1162_s15  }
   0x5   : > { %s958_s21 = sadd.s32 1, %s901_s18   ;;  %s73_s22 = sadd.s32 1, %s897_s17 }
   0x6   : > { %s70_s23 = ssub.s32 %s901_s18, %s958_s21  ;;  %p83_p0 = scmp.ne.s32.totalorder %s897_s17, %s893_s16 }
   0x7   : > { %p71_p1 = scmp.eq.s32.totalorder %s70_s23, 0  ;;  %p84_p2 = scmp.eq.s32.totalorder %s954_s19, 3 }
   0x8   : > { %p89_p3 = scmp.ne.s32.totalorder %s893_s16, %s889_s15  ;;  %p90_p4 = scmp.eq.s32.totalorder %s623_s20, 3 }
   0x9   : > { %s969_s24 = scalar_select %p71_p1, %s897_s17, %s73_s22  }
   0xa   : > { %p973_p5 = por %p84_p2, %p83_p0  ;;  %p977_p6 = por %p90_p4, %p89_p3 }
   0xb   : > { %p626_p7 = scmp.ge.s32.totalorder %s901_s18, 1  ;;  %p162_p8 = scmp.lt.s32.totalorder %s901_s18, 5 }
   0xd   : > { %p163_p9 = pnand %p626_p7, %p162_p8 }
   0xe   : > { %v211_v0 = vld [vmem:[%s1156_s1] sm:$0xff] (!%p163_p9)  ;;  %v212_v1 = vld [vmem:[%s1156_s1 + $0x8] sm:$0xff] (!%p163_p9)  ;;  %v213_v2 = vld [vmem:[%s1156_s1 + $0x10] sm:$0xff] (!%p163_p9)  ;;  %s628_s7 = sshll.u32 (!%p163_p9), %s954_s19, 4  ;;  %vm216_vm0 = vcmask (!%p163_p9), 293888   ;;  %vm265_vm1 = vcmask (!%p163_p9), 1043456  }
   0xf   : > { %166 = sbr.rel (%p163_p9) target bundleno = 370 (0x172), region = 28  ;;  %v714_v3 = vpack.c.bf16 (!%p163_p9), %v212_v1, %v211_v0  ;;  %v214_v4 = vld [vmem:[%s1156_s1 + $0x18] sm:$0xff] (!%p163_p9)  ;;  %p189_p10 = scmp.lt.s32.totalorder (!%p163_p9), %s628_s7, 63  ;;  %v215_v6 = vld [vmem:[%s1156_s1 + $0x20] sm:$0xf] (!%p163_p9) }
  0x10   : > { %v718_v5 = vpack.c.bf16 (!%p163_p9), %v214_v4, %v213_v2  ;;  %s181_s22 = sand.u32 (!%p163_p9), 1, %s893_s16   ;;  %p647_p11 = scmp.ne.s32.totalorder (!%p163_p9), %s954_s19, 0 }
  0x11   : > { %715 = vmatprep.subr.bf16.mxu0 (!%p163_p9), %v714_v3  ;;  %722 = vmatprep.subr.bf16.mxu1 (!%p163_p9), %v714_v3  ;;  %s627_s23 = sshll.u32 (!%p163_p9), %s181_s22, 7 }
  0x12   : > { %717 = vmatpush3.bf16.msra.mxu0 (!%p163_p9), %v714_v3  ;;  %725 = vmatpush3.bf16.msra.mxu1 (!%p163_p9), %v714_v3  ;;  %s1043_s27 = scalar_lea.vmem (!%p163_p9), [#allocation2], %s627_s23 }
  0x13   : > { %719 = vmatprep.subr.bf16.mxu0 (!%p163_p9), %v718_v5  ;;  %723 = vmatprep.subr.bf16.mxu1 (!%p163_p9), %v718_v5 }
  0x16   : > { %s1167_s7 = smov (!%p189_p10, %s628_s7), 63  ;;  %721 = vmatpush3.bf16.msra.mxu0 %v718_v5  ;;  %726 = vmatpush3.bf16.msra.mxu1 %v718_v5 }
  0x17   : > { %s629_s10 = sshll.u32 %s1167_s7, 3  ;;  %688 = vmatprep.subr.msk.mxu0 %vm265_vm1, %v215_v6  ;;  %724 = vmatprep.subr.msk.mxu1 %vm265_vm1, %v215_v6 }
  0x18   : > { %s1002_s20 = scalar_lea.vmem %s1155_s0, %s629_s10 }
  0x19   : > { %v195_v7 = vld [vmem:[%s1002_s20] sm:$0xff]  ;;  %v196_v9 = vld [vmem:[%s1002_s20 + $0x8] sm:$0xff]  ;;  %v197_v10 = vld [vmem:[%s1002_s20 + $0x10] sm:$0xff] }
  0x1a   : > { %690 = vmatprep.mubr.msk.f32.mxu0 %vm216_vm0, %v195_v7  ;;  %v203_v8 = vld [vmem:[%s1002_s20 + $0x40] sm:$0xff]  ;;  %v204_v11 = vld [vmem:[%s1002_s20 + $0x48] sm:$0xff]  ;;  %689 = vmatpush3.msk.msra.mxu0 %vm265_vm1, %v215_v6  ;;  %v205_v12 = vld [vmem:[%s1002_s20 + $0x50] sm:$0xff] }
  0x1b   : > { %702 = vmatprep.mubr.msk.f32.mxu1 %vm216_vm0, %v203_v8  ;;  %691 = vmatmul.mubr.msk.f32.vlgmr.msra.gmra.mrb[0].mxu0 %vm216_vm0, %v196_v9  ;;  %v198_v13 = vld [vmem:[%s1002_s20 + $0x18] sm:$0xff]  ;;  %v199_v14 = vld [vmem:[%s1002_s20 + $0x20] sm:$0xff]  ;;  %v200_v17 = vld [vmem:[%s1002_s20 + $0x28] sm:$0xff] }
  0x1c   : > { %727 = vmatpush3.msk.msra.mxu1 %vm265_vm1, %v215_v6  ;;  %693 = vmatprep.mubr.msk.f32.mxu0 %vm216_vm0, %v197_v10  ;;  %v206_v15 = vld [vmem:[%s1002_s20 + $0x58] sm:$0xff]  ;;  %v207_v16 = vld [vmem:[%s1002_s20 + $0x60] sm:$0xff]  ;;  %v201_v18 = vld [vmem:[%s1002_s20 + $0x30] sm:$0xff] }
  0x1d   : > { %703 = vmatmul.mubr.msk.f32.vlgmr.msra.gmra.mrb[0].mxu1 %vm216_vm0, %v204_v11  ;;  %v208_v19 = vld [vmem:[%s1002_s20 + $0x68] sm:$0xff]  ;;  %v209_v20 = vld [vmem:[%s1002_s20 + $0x70] sm:$0xff]  ;;  %v202_v21 = vld [vmem:[%s1002_s20 + $0x38] sm:$0xff] }
  0x1e   : > { %705 = vmatprep.mubr.msk.f32.mxu1 %vm216_vm0, %v205_v12  ;;  %v210_v22 = vld [vmem:[%s1002_s20 + $0x78] sm:$0xff] }
  0x1f   : > { %694 = vmatmul.mubr.msk.f32.gmra.mrb[2].mxu0 %vm216_vm0, %v198_v13 }
  0x20   : > { %696 = vmatprep.mubr.msk.f32.mxu0 %vm216_vm0, %v199_v14 }
  0x21   : > { %706 = vmatmul.mubr.msk.f32.gmra.mrb[2].mxu1 %vm216_vm0, %v206_v15 }
  0x22   : > { %708 = vmatprep.mubr.msk.f32.mxu1 %vm216_vm0, %v207_v16 }
  0x23   : > { %697 = vmatmul.mubr.msk.f32.gmra.mrb[4].mxu0 %vm216_vm0, %v200_v17 }
  0x24   : > { %699 = vmatprep.mubr.msk.f32.mxu0 %vm216_vm0, %v201_v18 }
  0x25   : > { %709 = vmatmul.mubr.msk.f32.gmra.mrb[4].mxu1 %vm216_vm0, %v208_v19 }
  0x26   : > { %711 = vmatprep.mubr.msk.f32.mxu1 %vm216_vm0, %v209_v20 }
  0x27   : > { %700 = vmatmul.mubr.msk.f32.gmra.mrb[6].mxu0 %vm216_vm0, %v202_v21 }
  0x29   : > { %712 = vmatmul.mubr.msk.f32.gmra.mrb[6].mxu1 %vm216_vm0, %v210_v22 }
  0xee   : > { %v692_v23 = vpop.f32.mrb[0].mxu0 }
  0xef   : > { %415 = vst [vmem:[%s1043_s27 + $0x8] sm:$0xff] %v692_v23  ;;  %v452_v24 = vmul.f32 %v692_v23, %v692_v23  ;;  %v335_v25 = vpop.f32.mrb[1].mxu0 }
  0xf0   : > { %v704_v26 = vpop.f32.mrb[0].mxu1  ;;  %414 = vst [vmem:[%s1043_s27] sm:$0xff] %v335_v25  ;;  %v430_v27 = vadd.f32 %v692_v23, %v335_v25  ;;  %v451_v28 = vmul.f32 %v335_v25, %v335_v25 }
  0xf1   : > { %423 = vst [vmem:[%s1043_s27 + $0x48] sm:$0xff] %v704_v26  ;;  %v375_v29 = vpop.f32.mrb[1].mxu1  ;;  %v460_v63 = vmul.f32 %v704_v26, %v704_v26 }
  0xf2   : > { %422 = vst [vmem:[%s1043_s27 + $0x40] sm:$0xff] %v375_v29  ;;  %v467_v30 = vadd.f32 %v452_v24, %v451_v28  ;;  %v695_v31 = vpop.f32.mrb[2].mxu0  ;;  %v459_v60 = vmul.f32 %v375_v29, %v375_v29 }
  0xf3   : > { %417 = vst [vmem:[%s1043_s27 + $0x18] sm:$0xff] %v695_v31  ;;  %v345_v32 = vpop.f32.mrb[3].mxu0  ;;  %v454_v37 = vmul.f32 %v695_v31, %v695_v31 }
  0xf4   : > { %v707_v33 = vpop.f32.mrb[2].mxu1  ;;  %416 = vst [vmem:[%s1043_s27 + $0x10] sm:$0xff] %v345_v32  ;;  %v431_v34 = vadd.f32 %v430_v27, %v345_v32  ;;  %v453_v35 = vmul.f32 %v345_v32, %v345_v32 }
  0xf5   : > { %425 = vst [vmem:[%s1043_s27 + $0x58] sm:$0xff] %v707_v33  ;;  %v385_v36 = vpop.f32.mrb[3].mxu1  ;;  %v462_v5 = vmul.f32 %v707_v33, %v707_v33 }
  0xf6   : > { %424 = vst [vmem:[%s1043_s27 + $0x50] sm:$0xff] %v385_v36  ;;  %v468_v38 = vadd.f32 %v467_v30, %v453_v35  ;;  %v698_v39 = vpop.f32.mrb[4].mxu0  ;;  %v432_v40 = vadd.f32 %v695_v31, %v431_v34  ;;  %v461_v2 = vmul.f32 %v385_v36, %v385_v36 }
  0xf7   : > { %419 = vst [vmem:[%s1043_s27 + $0x28] sm:$0xff] %v698_v39  ;;  %v355_v41 = vpop.f32.mrb[5].mxu0  ;;  %v456_v47 = vmul.f32 %v698_v39, %v698_v39 }
  0xf8   : > { %v710_v42 = vpop.f32.mrb[4].mxu1  ;;  %418 = vst [vmem:[%s1043_s27 + $0x20] sm:$0xff] %v355_v41  ;;  %v433_v43 = vadd.f32 %v432_v40, %v355_v41  ;;  %v455_v44 = vmul.f32 %v355_v41, %v355_v41  ;;  %v469_v45 = vadd.f32 %v468_v38, %v454_v37 }
  0xf9   : > { %427 = vst [vmem:[%s1043_s27 + $0x68] sm:$0xff] %v710_v42  ;;  %v395_v46 = vpop.f32.mrb[5].mxu1  ;;  %v464_v11 = vmul.f32 %v710_v42, %v710_v42 }
  0xfa   : > { %426 = vst [vmem:[%s1043_s27 + $0x60] sm:$0xff] %v395_v46  ;;  %v470_v48 = vadd.f32 %v469_v45, %v455_v44  ;;  %v701_v49 = vpop.f32.mrb[6].mxu0  ;;  %v434_v50 = vadd.f32 %v698_v39, %v433_v43  ;;  %v463_v8 = vmul.f32 %v395_v46, %v395_v46 }
  0xfb   : > { %421 = vst [vmem:[%s1043_s27 + $0x38] sm:$0xff] %v701_v49  ;;  %v365_v51 = vpop.f32.mrb[7].mxu0  ;;  %v458_v57 = vmul.f32 %v701_v49, %v701_v49 }
  0xfc   : > { %v713_v52 = vpop.f32.mrb[6].mxu1  ;;  %420 = vst [vmem:[%s1043_s27 + $0x30] sm:$0xff] %v365_v51  ;;  %v435_v53 = vadd.f32 %v434_v50, %v365_v51  ;;  %v457_v54 = vmul.f32 %v365_v51, %v365_v51  ;;  %v471_v55 = vadd.f32 %v470_v48, %v456_v47 }
  0xfd   : > { %429 = vst [vmem:[%s1043_s27 + $0x78] sm:$0xff] %v713_v52  ;;  %v405_v56 = vpop.f32.mrb[7].mxu1  ;;  %v466_v17 = vmul.f32 %v713_v52, %v713_v52 }
  0xfe   : > { %428 = vst [vmem:[%s1043_s27 + $0x70] sm:$0xff] %v405_v56  ;;  %v436_v58 = vadd.f32 %v701_v49, %v435_v53  ;;  %v472_v59 = vadd.f32 %v471_v55, %v457_v54  ;;  %v465_v14 = vmul.f32 %v405_v56, %v405_v56 }
 0x100   : > { %v473_v61 = vadd.f32 %v472_v59, %v458_v57  ;;  %v437_v62 = vadd.f32 %v436_v58, %v375_v29 }
 0x102   : > { %v474_v0 = vadd.f32 %v473_v61, %v459_v60  ;;  %v438_v1 = vadd.f32 %v704_v26, %v437_v62 }
 0x104   : > { %v439_v3 = vadd.f32 %v438_v1, %v385_v36  ;;  %v475_v4 = vadd.f32 %v474_v0, %v460_v63 }
 0x106   : > { %v476_v6 = vadd.f32 %v475_v4, %v461_v2  ;;  %v440_v7 = vadd.f32 %v707_v33, %v439_v3 }
 0x108   : > { %v441_v9 = vadd.f32 %v440_v7, %v395_v46  ;;  %v477_v10 = vadd.f32 %v476_v6, %v462_v5 }
 0x10a   : > { %v478_v12 = vadd.f32 %v477_v10, %v463_v8  ;;  %v442_v13 = vadd.f32 %v710_v42, %v441_v9 }
 0x10c   : > { %v443_v15 = vadd.f32 %v442_v13, %v405_v56  ;;  %v479_v16 = vadd.f32 %v478_v12, %v464_v11 }
 0x10e   : > { %v444_v18 = vadd.f32 %v713_v52, %v443_v15  ;;  %v480_v19 = vadd.f32 %v479_v16, %v465_v14 }
 0x110   : > { %v445_v20 = vrot.slane %v444_v18, 4  ;;  %v481_v21 = vadd.f32 %v480_v19, %v466_v17 }
 0x112   : > { %v446_v22 = vadd.f32 %v445_v20, %v444_v18  ;;  %v482_v23 = vrot.slane %v481_v21, 4 }
 0x114   : > { %v447_v24 = vrot.slane %v446_v22, 2  ;;  %v483_v25 = vadd.f32 %v482_v23, %v481_v21 }
 0x116   : > { %v448_v26 = vadd.f32 %v447_v24, %v446_v22  ;;  %v484_v27 = vrot.slane %v483_v25, 2  ;;  %491 = sbr.rel (%p647_p11) target bundleno = 287 (0x11f), region = 32 }
 0x118   : > { %v449_v28 = vrot.slane %v448_v26, 1  ;;  %v485_v29 = vadd.f32 %v484_v27, %v483_v25 }
 0x11a   : > { %v450_v30 = vadd.f32 %v449_v28, %v448_v26  ;;  %v486_v31 = vrot.slane %v485_v29, 1 }
 0x11c   : > { %v487_v32 = vadd.f32 %v486_v31, %v485_v29  ;;  %492 = vst [vmem:[#allocation4] sm:$0x1] (!%p647_p11), %v450_v30 }
 0x11e   : > { %493 = vst [vmem:[#allocation6] sm:$0x1] %v487_v32 }
 0x11f PF: > { %p648_p12 = scmp.le.s32.totalorder %s954_s19, 0 }
 0x121   : > { %497 = sbr.rel (%p648_p12) target bundleno = 297 (0x129), region = 36 }
 0x125   : > { %v498_v33 = vld [vmem:[#allocation4] sm:$0x1] (!%p648_p12)  ;;  %v501_v34 = vld [vmem:[#allocation6] sm:$0x1] (!%p648_p12) }
 0x126   : > { %v499_v35 = vadd.f32 (!%p648_p12), %v498_v33, %v450_v30  ;;  %v502_v36 = vadd.f32 (!%p648_p12), %v501_v34, %v487_v32 }
 0x128   : > { %500 = vst [vmem:[#allocation4] sm:$0x1] %v499_v35  ;;  %503 = vst [vmem:[#allocation6] sm:$0x1] %v502_v36 }
 0x129 PF: > { %s903_s28 = smov [#allocation4]   ;;  %s658_s30 = sshll.u32 %s954_s19, 11 }
 0x12a   : > { %s532_s29 = sshll.u32 %s903_s28, 4  ;;  %s533_s29 = int_to_ptr.vmem [resolvable:$true] %s532_s29 }
 0x12b   : > { %s783_s5 = scalar_lea.vmem %s533_s29, 16  ;;  %s789_s6 = scalar_lea.vmem %s533_s29, 32 }
 0x12c   : > { %p784_p13 = scmp.ne.s32.totalorder %s533_s29, %s783_s5  ;;  %p790_p3 = scmp.lt.s32.totalorder %s533_s29, %s533_s29 }
 0x12d   : > { %p791_p4 = scmp.lt.s32.totalorder %s789_s6, %s783_s5 }
 0x12e   : > { %p785_p0 = pnand %p784_p13, %p84_p2 }
 0x12f   : > { %p792_p7 = por %p791_p4, %p790_p3 }
 0x130   : > { %p786_p1 = pneg %p785_p0 }
 0x132   : > { %p793_p8 = pnand %p792_p7, %p786_p1 }
 0x134   : > { %796 = shalt.err (!%p793_p8)
}
 0x135   : > { %s797_s9 = scalar_lea.hbm %s1158_s3, 16 }
 0x136   : > { %p798_p9 = scmp.ne.s32.totalorder %s1158_s3, %s797_s9  ;;  %p803_p12 = scmp.lt.u32.totalorder %s797_s9, %s1158_s3 }
 0x138   : > { %p799_p10 = pnand %p798_p9, %p84_p2 }
 0x13a   : > { %p800_p11 = pneg %p799_p10 }
 0x13c   : > { %p805_p13 = pnand %p803_p12, %p800_p11 }
 0x13e   : > { %808 = shalt.err (!%p805_p13)
}
 0x13f   : > { %730 = dma.vmem_to_hbm [thread:$0]  (%p84_p2), %s533_s29, 16, %s1158_s3, [#allocation5]  }
 0x140   : > { %s1085_s5 = scalar_lea.hbm %s1157_s2, %s658_s30  ;;  %s518_s6 = sshll.u32 %s1043_s27, 4  ;;  %s1088_s6 = int_to_ptr.vmem [resolvable:$true] %s518_s6 }
 0x141   : > { %s1092_s7 = scalar_lea.sflag [#allocation3], %s181_s22  ;;  %s809_s8 = scalar_lea.vmem %s1088_s6, 2048 }
 0x142   : > { %p810_p0 = scmp.ne.s32.totalorder %s1088_s6, %s809_s8  ;;  %s904_s29 = smov [#allocation2]  }
 0x143   : > { %s813_s9 = sshll.u32 %s904_s29, 4  ;;  %s814_s9 = int_to_ptr.vmem [resolvable:$false] %s813_s9 }
 0x144   : > { %p811_p1 = pnand %p810_p0, %p973_p5  ;;  %s815_s10 = scalar_lea.vmem %s814_s9, 4096 }
 0x145   : > { %p816_p4 = scmp.lt.s32.totalorder %s1088_s6, %s814_s9  ;;  %p817_p7 = scmp.lt.s32.totalorder %s815_s10, %s809_s8 }
 0x146   : > { %p812_p3 = pneg %p811_p1 }
 0x147   : > { %p818_p8 = por %p817_p7, %p816_p4 }
 0x149   : > { %p819_p9 = pnand %p818_p8, %p812_p3 }
 0x14b   : > { %822 = shalt.err (!%p819_p9)
}
 0x14c   : > { %s823_s22 = scalar_lea.hbm %s1085_s5, 2048  ;;  %s827_s11 = scalar_lea.hbm %s1157_s2, 8192 }
 0x14d   : > { %p824_p10 = scmp.ne.s32.totalorder %s1085_s5, %s823_s22  ;;  %p828_p13 = scmp.lt.u32.totalorder %s1085_s5, %s1157_s2 }
 0x14e   : > { %p829_p0 = scmp.lt.u32.totalorder %s827_s11, %s823_s22  ;;  %p831_p3 = scmp.lt.u32.totalorder %s823_s22, %s1085_s5 }
 0x14f   : > { %p825_p11 = pnand %p824_p10, %p973_p5 }
 0x150   : > { %p830_p1 = por %p829_p0, %p828_p13 }
 0x151   : > { %p826_p12 = pneg %p825_p11 }
 0x152   : > { %p832_p4 = por %p831_p3, %p830_p1 }
 0x154   : > { %p833_p7 = pnand %p832_p4, %p826_p12 }
 0x156   : > { %836 = shalt.err (!%p833_p7)
}
 0x157   : > { %s905_s14 = smov 128   ;;  %s906_s20 = smov 8  }
 0x158   : > { %728 = dma.vmem_to_hbm [thread:$0]  (%p973_p5), %s1088_s6, 2048, %s1085_s5, %s1092_s7, %s905_s14, %s905_s14, %s906_s20  }
 0x159   : > { %s907_s23 = smov [#allocation6]  }
 0x15a   : > { %s543_s28 = sshll.u32 %s907_s23, 4  ;;  %s544_s28 = int_to_ptr.vmem [resolvable:$true] %s543_s28 }
 0x15b   : > { %s837_s8 = scalar_lea.vmem %s544_s28, 16  ;;  %s843_s29 = scalar_lea.vmem %s544_s28, 32 }
 0x15c   : > { %p838_p8 = scmp.ne.s32.totalorder %s544_s28, %s837_s8  ;;  %p844_p11 = scmp.lt.s32.totalorder %s544_s28, %s544_s28 }
 0x15d   : > { %p845_p12 = scmp.lt.s32.totalorder %s843_s29, %s837_s8 }
 0x15e   : > { %p839_p9 = pnand %p838_p8, %p84_p2 }
 0x15f   : > { %p846_p13 = por %p845_p12, %p844_p11 }
 0x160   : > { %p840_p10 = pneg %p839_p9 }
 0x162   : > { %p847_p0 = pnand %p846_p13, %p840_p10 }
 0x164   : > { %850 = shalt.err (!%p847_p0)
}
 0x165   : > { %s851_s25 = scalar_lea.hbm %s1159_s4, 16 }
 0x166   : > { %p852_p5 = scmp.ne.s32.totalorder %s1159_s4, %s851_s25  ;;  %p857_p4 = scmp.lt.u32.totalorder %s851_s25, %s1159_s4 }
 0x168   : > { %p853_p1 = pnand %p852_p5, %p84_p2 }
 0x16a   : > { %p854_p3 = pneg %p853_p1 }
 0x16c   : > { %p859_p7 = pnand %p857_p4, %p854_p3 }
 0x16e   : > { %862 = shalt.err (!%p859_p7)
}
 0x16f   : > { %732 = dma.vmem_to_hbm [thread:$0]  (%p84_p2), %s544_s28, 16, %s1159_s4, [#allocation5]  }
 0x170   : > { %880 = dma.done.wait (%p84_p2), [#allocation5], 32  }
 0x171   : > { %882 = vsyncadd (%p84_p2), [#allocation5], 4294967264 }
 0x172 PF: > { %p746_p8 = scmp.ge.s32.totalorder %s901_s18, 2  ;;  %s563_s11 = sand.u32 1, %s889_s15  }
 0x173   : > { %s564_s12 = scalar_lea.sflag [#allocation3], %s563_s11 }
 0x174   : > { %p739_p9 = pnand %p746_p8, %p977_p6 }
 0x176   : > { %884 = dma.done.wait (!%p739_p9), %s564_s12, 2048  }
 0x177   : > { %886 = vsyncadd (!%p739_p9), %s564_s12, 4294965248  ;;  %p16_p10 = scmp.ge.s32.totalorder %s958_s21, 6   ;;  %s1162_s15 = smov %s893_s16 }
 0x178   : > { %s1163_s16 = smov %s897_s17  ;;  %s1164_s17 = smov %s969_s24 }
 0x179   : > { %s1165_s18 = smov %s958_s21  ;;  %18 = sbr.rel (!%p16_p10) target bundleno = 4 (0x4), region = 87 }
 0x180   :  { %569 = vsyncpa [#allocation3], 1 }
 0x181   :  { %571 = vsyncpa [#allocation3 + $0x1], 1 }
 0x182   :  { %572 = vsyncpa [#allocation5], 1 }

</bundles_post_ra>
